<compile_context>
chip_gen: v7x
topology: tpu7x:2x2x1
jax: 0.10.0
libtpu: 0.0.40
codegen_flags: <defaults>
</compile_context>

<pallas_src>
import functools

import jax
import jax.numpy as jnp
from jax import lax
from jax.experimental import pallas as pl
from jax.experimental.pallas import tpu as pltpu

D = 6    # model feature dim (fixed by the PyTorch module)
H = 32   # FFN hidden width

# Param-slab layout, single (16, 128) f32 array:
#   rows 0:6 , lanes  0:18 : [ Wq | Wk | Wv ]  fused QKV weight (6, 18)
#   rows 0:6 , lanes 18:50 : W1                FFN-1 weight     (6, 32)
#   rows 0:6 , lanes 50:82 : W2^T              FFN-2 weight^T   (6, 32)
#   row  8   , lanes  0:32 : b1
#   row  9   , lanes  0:6  : b2
#   row 10   , lanes  0:6  : wp^T (prediction-head weight)
#   row 11   , lane   0    : bp   (prediction-head bias)
_SLAB_ROWS, _SLAB_LANES = 16, 128


def _model_kernel(x_ref, w_ref, out_ref, *, B, L):
    # x_ref : (B*L, 6) tokens, features on lanes
    # w_ref : (16, 128) fused parameter slab (layout above)
    # out   : (1, B) lane-dense
    x2d = x_ref[...]
    w = w_ref[...]

    # ---- fused QKV projection: one MXU push on the collapsed token view ----
    qkv = jnp.dot(x2d, w[0:D, 0:3 * D], preferred_element_type=jnp.float32)   # (B*L, 18)
    q = qkv[:, 0:D].reshape(B, L, D)
    k = qkv[:, D:2 * D].reshape(B, L, D)
    v = qkv[:, 2 * D:3 * D].reshape(B, L, D)

    # ---- attention logits on the VPU (K-dim = 6, far too small for an MXU tile) ----
    kt = jnp.swapaxes(k, 1, 2)                              # (B, D, L)
    logits = q[:, :, 0:1] * kt[:, 0:1, :]                   # (B, L, L)
    for e in range(1, D):
        logits = logits + q[:, :, e:e + 1] * kt[:, e:e + 1, :]

    # ---- softmax(dim=-1); exact divide (keeps bit-tight accuracy, cost is noise here) ----
    m = jnp.max(logits, axis=-1, keepdims=True)
    p = jnp.exp(logits - m)
    attn = p / jnp.sum(p, axis=-1, keepdims=True)

    # ---- attn @ V on the VPU (K-dim = L = 8; use batched dot_general instead once L > ~32) ----
    h = attn[:, :, 0:1] * v[:, 0:1, :]                      # (B, L, D)
    for t in range(1, L):
        h = h + attn[:, :, t:t + 1] * v[:, t:t + 1, :]

    # ---- FFN: Linear(6,32) -> Linear(32,6) (W2 stored transposed), then ReLU ----
    h2d = h.reshape(B * L, D)
    h1 = jnp.dot(h2d, w[0:D, 3 * D:3 * D + H],
                 preferred_element_type=jnp.float32) + w[8:9, 0:H]            # (B*L, 32)
    h2 = lax.dot_general(h1, w[0:D, 3 * D + H:3 * D + 2 * H],
                         dimension_numbers=(((1,), (1,)), ((), ())),
                         preferred_element_type=jnp.float32) + w[9:10, 0:D]   # (B*L, 6)
    h2 = jnp.maximum(h2, 0.0)

    # ---- mean-pool over sequence + prediction head; lane-dense (1, B) store ----
    pooled = jnp.mean(h2.reshape(B, L, D), axis=1)          # (B, 6)
    head = jnp.sum(pooled * w[10:11, 0:D], axis=-1, keepdims=True) + w[11:12, 0:1]  # (B, 1)
    out_ref[...] = head.reshape(1, B)


def pack_params(params):
    """Build the fused (16, 128) parameter slab ONCE — off the per-inference hot path."""
    slab = jnp.zeros((_SLAB_ROWS, _SLAB_LANES), jnp.float32)
    slab = slab.at[0:D, 0:D].set(params['wq'])
    slab = slab.at[0:D, D:2 * D].set(params['wk'])
    slab = slab.at[0:D, 2 * D:3 * D].set(params['wv'])
    slab = slab.at[0:D, 3 * D:3 * D + H].set(params['w1'])
    slab = slab.at[0:D, 3 * D + H:3 * D + 2 * H].set(params['w2'].T)
    slab = slab.at[8, 0:H].set(params['b1'][0])
    slab = slab.at[9, 0:D].set(params['b2'][0])
    slab = slab.at[10, 0:D].set(params['wp'][:, 0])
    slab = slab.at[11, 0].set(params['bp'][0, 0])
    return slab


def self_attention_predict(x, slab):
    """x: (B, L, 6) float32, slab: pack_params(...) output.  Returns (B,) float32."""
    B, L, d = x.shape
    assert d == D
    x2d = x.reshape(B * L, D)
    kernel = functools.partial(_model_kernel, B=B, L=L)
    vmem = pl.BlockSpec(memory_space=pltpu.MemorySpace.VMEM)
    out = pl.pallas_call(
        kernel,
        out_shape=jax.ShapeDtypeStruct((1, B), jnp.float32),
        in_specs=[vmem, vmem],
        out_specs=vmem,
    )(x2d, slab)
    return out[0]


def init_params(key):
    ks = jax.random.split(key, 9)
    # SelfAttention: W_q, W_k, W_v = randn(6,6)/100
    wq = jax.random.normal(ks[0], (6, 6), jnp.float32) / 100.0
    wk = jax.random.normal(ks[1], (6, 6), jnp.float32) / 100.0
    wv = jax.random.normal(ks[2], (6, 6), jnp.float32) / 100.0
    # fnn: Linear(6,32) -> Linear(32,6)  (stored transposed so we right-multiply)
    w1 = jax.random.normal(ks[3], (6, 32), jnp.float32) * 0.1
    b1 = jax.random.normal(ks[4], (1, 32), jnp.float32) * 0.1
    w2 = jax.random.normal(ks[5], (32, 6), jnp.float32) * 0.1
    b2 = jax.random.normal(ks[6], (1, 6), jnp.float32) * 0.1
    # prediction: Linear(6,1)
    wp = jax.random.normal(ks[7], (6, 1), jnp.float32) * 0.1
    bp = jax.random.normal(ks[8], (1, 1), jnp.float32) * 0.1
    return dict(wq=wq, wk=wk, wv=wv, w1=w1, b1=b1, w2=w2, b2=b2, wp=wp, bp=bp)


def reference(x, p):
    q = x @ p['wq']; k = x @ p['wk']; v = x @ p['wv']
    # NOTE: no 1/sqrt(d_k) scale, matching the original PyTorch module.
    attn = jax.nn.softmax(jnp.einsum('bqe,bke->bqk', q, k), axis=-1)
    h = jnp.einsum('bqk,bke->bqe', attn, v)
    h = h @ p['w1'] + p['b1']
    h = h @ p['w2'] + p['b2']
    h = jax.nn.relu(h)
    pooled = h.mean(axis=1)
    return (pooled @ p['wp'] + p['bp'])[:, 0]


if __name__ == "__main__":
    key = jax.random.PRNGKey(0)
    kx, kp = jax.random.split(key)
    B, L = 2, 8
    x = jax.random.normal(kx, (B, L, D), jnp.float32)
    params = init_params(kp)
    slab = pack_params(params)          # packed once, off the hot path

    y = self_attention_predict(x, slab)
    y = jax.block_until_ready(y)

    y_ref = reference(x, params)
    assert y.shape == (B,)
    assert jnp.allclose(y, y_ref, atol=1e-5, rtol=1e-5), (y, y_ref)
    print("KERNEL_OK")
</pallas_src>

<mosaic_0001>
module attributes {stable_mosaic.version = 11 : i64} {
  func.func @_model_kernel(%arg0: memref<16x6xf32, #tpu.memory_space<vmem>>, %arg1: memref<16x128xf32, #tpu.memory_space<vmem>>, %arg2: memref<1x2xf32, #tpu.memory_space<vmem>>) attributes {dimension_semantics = [], scalar_prefetch = 0 : i64, scratch_operands = 0 : i64, tpu.core_type = #tpu.core_type<tc>} {
    %c0 = arith.constant 0 : index
    %c0_0 = arith.constant 0 : index
    %0 = vector.load %arg0[%c0, %c0_0] : memref<16x6xf32, #tpu.memory_space<vmem>>, vector<16x6xf32>
    %c0_1 = arith.constant 0 : index
    %c0_2 = arith.constant 0 : index
    %1 = vector.load %arg1[%c0_1, %c0_2] : memref<16x128xf32, #tpu.memory_space<vmem>>, vector<16x128xf32>
    %2 = vector.extract_strided_slice %1 {offsets = [0, 0], sizes = [6, 18], strides = [1, 1]} : vector<16x128xf32> to vector<6x18xf32>
    %cst = arith.constant dense<0.000000e+00> : vector<16x18xf32>
    %3 = tpu.matmul %0, %2, %cst {dimension_numbers = #tpu.dot_dimension_numbers<[1], [0], [0], [1], [0, 0, 1, 1], [], []>} : vector<16x6xf32>, vector<6x18xf32>, vector<16x18xf32> -> vector<16x18xf32>
    %4 = vector.extract_strided_slice %3 {offsets = [0, 0], sizes = [16, 6], strides = [1, 1]} : vector<16x18xf32> to vector<16x6xf32>
    %5 = vector.shape_cast %4 : vector<16x6xf32> to vector<2x8x6xf32>
    %6 = vector.extract_strided_slice %3 {offsets = [0, 6], sizes = [16, 6], strides = [1, 1]} : vector<16x18xf32> to vector<16x6xf32>
    %7 = vector.shape_cast %6 : vector<16x6xf32> to vector<2x8x6xf32>
    %8 = vector.extract_strided_slice %3 {offsets = [0, 12], sizes = [16, 6], strides = [1, 1]} : vector<16x18xf32> to vector<16x6xf32>
    %9 = vector.shape_cast %8 : vector<16x6xf32> to vector<2x8x6xf32>
    %10 = tpu.transpose %7, [0, 2, 1] : vector<2x8x6xf32> -> vector<2x6x8xf32>
    %11 = vector.extract_strided_slice %5 {offsets = [0, 0, 0], sizes = [2, 8, 1], strides = [1, 1, 1]} : vector<2x8x6xf32> to vector<2x8x1xf32>
    %12 = vector.extract_strided_slice %10 {offsets = [0, 0, 0], sizes = [2, 1, 8], strides = [1, 1, 1]} : vector<2x6x8xf32> to vector<2x1x8xf32>
    %13 = vector.broadcast %11 : vector<2x8x1xf32> to vector<2x8x8xf32>
    %14 = vector.broadcast %12 : vector<2x1x8xf32> to vector<2x8x8xf32>
    %15 = arith.mulf %13, %14 : vector<2x8x8xf32>
    %16 = vector.extract_strided_slice %5 {offsets = [0, 0, 1], sizes = [2, 8, 1], strides = [1, 1, 1]} : vector<2x8x6xf32> to vector<2x8x1xf32>
    %17 = vector.extract_strided_slice %10 {offsets = [0, 1, 0], sizes = [2, 1, 8], strides = [1, 1, 1]} : vector<2x6x8xf32> to vector<2x1x8xf32>
    %18 = vector.broadcast %16 : vector<2x8x1xf32> to vector<2x8x8xf32>
    %19 = vector.broadcast %17 : vector<2x1x8xf32> to vector<2x8x8xf32>
    %20 = arith.mulf %18, %19 : vector<2x8x8xf32>
    %21 = arith.addf %15, %20 : vector<2x8x8xf32>
    %22 = vector.extract_strided_slice %5 {offsets = [0, 0, 2], sizes = [2, 8, 1], strides = [1, 1, 1]} : vector<2x8x6xf32> to vector<2x8x1xf32>
    %23 = vector.extract_strided_slice %10 {offsets = [0, 2, 0], sizes = [2, 1, 8], strides = [1, 1, 1]} : vector<2x6x8xf32> to vector<2x1x8xf32>
    %24 = vector.broadcast %22 : vector<2x8x1xf32> to vector<2x8x8xf32>
    %25 = vector.broadcast %23 : vector<2x1x8xf32> to vector<2x8x8xf32>
    %26 = arith.mulf %24, %25 : vector<2x8x8xf32>
    %27 = arith.addf %21, %26 : vector<2x8x8xf32>
    %28 = vector.extract_strided_slice %5 {offsets = [0, 0, 3], sizes = [2, 8, 1], strides = [1, 1, 1]} : vector<2x8x6xf32> to vector<2x8x1xf32>
    %29 = vector.extract_strided_slice %10 {offsets = [0, 3, 0], sizes = [2, 1, 8], strides = [1, 1, 1]} : vector<2x6x8xf32> to vector<2x1x8xf32>
    %30 = vector.broadcast %28 : vector<2x8x1xf32> to vector<2x8x8xf32>
    %31 = vector.broadcast %29 : vector<2x1x8xf32> to vector<2x8x8xf32>
    %32 = arith.mulf %30, %31 : vector<2x8x8xf32>
    %33 = arith.addf %27, %32 : vector<2x8x8xf32>
    %34 = vector.extract_strided_slice %5 {offsets = [0, 0, 4], sizes = [2, 8, 1], strides = [1, 1, 1]} : vector<2x8x6xf32> to vector<2x8x1xf32>
    %35 = vector.extract_strided_slice %10 {offsets = [0, 4, 0], sizes = [2, 1, 8], strides = [1, 1, 1]} : vector<2x6x8xf32> to vector<2x1x8xf32>
    %36 = vector.broadcast %34 : vector<2x8x1xf32> to vector<2x8x8xf32>
    %37 = vector.broadcast %35 : vector<2x1x8xf32> to vector<2x8x8xf32>
    %38 = arith.mulf %36, %37 : vector<2x8x8xf32>
    %39 = arith.addf %33, %38 : vector<2x8x8xf32>
    %40 = vector.extract_strided_slice %5 {offsets = [0, 0, 5], sizes = [2, 8, 1], strides = [1, 1, 1]} : vector<2x8x6xf32> to vector<2x8x1xf32>
    %41 = vector.extract_strided_slice %10 {offsets = [0, 5, 0], sizes = [2, 1, 8], strides = [1, 1, 1]} : vector<2x6x8xf32> to vector<2x1x8xf32>
    %42 = vector.broadcast %40 : vector<2x8x1xf32> to vector<2x8x8xf32>
    %43 = vector.broadcast %41 : vector<2x1x8xf32> to vector<2x8x8xf32>
    %44 = arith.mulf %42, %43 : vector<2x8x8xf32>
    %45 = arith.addf %39, %44 : vector<2x8x8xf32>
    %cst_3 = arith.constant dense<0xFF800000> : vector<2x8xf32>
    %46 = vector.multi_reduction <maximumf>, %45, %cst_3 [2] : vector<2x8x8xf32> to vector<2x8xf32>
    %47 = vector.shape_cast %46 : vector<2x8xf32> to vector<2x8x1xf32>
    %48 = vector.broadcast %47 : vector<2x8x1xf32> to vector<2x8x8xf32>
    %49 = arith.subf %45, %48 : vector<2x8x8xf32>
    %50 = math.exp %49 : vector<2x8x8xf32>
    %cst_4 = arith.constant dense<0.000000e+00> : vector<2x8xf32>
    %51 = vector.multi_reduction <add>, %50, %cst_4 [2] : vector<2x8x8xf32> to vector<2x8xf32>
    %52 = vector.shape_cast %51 : vector<2x8xf32> to vector<2x8x1xf32>
    %53 = vector.broadcast %52 : vector<2x8x1xf32> to vector<2x8x8xf32>
    %54 = arith.divf %50, %53 : vector<2x8x8xf32>
    %55 = vector.extract_strided_slice %54 {offsets = [0, 0, 0], sizes = [2, 8, 1], strides = [1, 1, 1]} : vector<2x8x8xf32> to vector<2x8x1xf32>
    %56 = vector.extract_strided_slice %9 {offsets = [0, 0, 0], sizes = [2, 1, 6], strides = [1, 1, 1]} : vector<2x8x6xf32> to vector<2x1x6xf32>
    %57 = vector.broadcast %55 : vector<2x8x1xf32> to vector<2x8x6xf32>
    %58 = vector.broadcast %56 : vector<2x1x6xf32> to vector<2x8x6xf32>
    %59 = arith.mulf %57, %58 : vector<2x8x6xf32>
    %60 = vector.extract_strided_slice %54 {offsets = [0, 0, 1], sizes = [2, 8, 1], strides = [1, 1, 1]} : vector<2x8x8xf32> to vector<2x8x1xf32>
    %61 = vector.extract_strided_slice %9 {offsets = [0, 1, 0], sizes = [2, 1, 6], strides = [1, 1, 1]} : vector<2x8x6xf32> to vector<2x1x6xf32>
    %62 = vector.broadcast %60 : vector<2x8x1xf32> to vector<2x8x6xf32>
    %63 = vector.broadcast %61 : vector<2x1x6xf32> to vector<2x8x6xf32>
    %64 = arith.mulf %62, %63 : vector<2x8x6xf32>
    %65 = arith.addf %59, %64 : vector<2x8x6xf32>
    %66 = vector.extract_strided_slice %54 {offsets = [0, 0, 2], sizes = [2, 8, 1], strides = [1, 1, 1]} : vector<2x8x8xf32> to vector<2x8x1xf32>
    %67 = vector.extract_strided_slice %9 {offsets = [0, 2, 0], sizes = [2, 1, 6], strides = [1, 1, 1]} : vector<2x8x6xf32> to vector<2x1x6xf32>
    %68 = vector.broadcast %66 : vector<2x8x1xf32> to vector<2x8x6xf32>
    %69 = vector.broadcast %67 : vector<2x1x6xf32> to vector<2x8x6xf32>
    %70 = arith.mulf %68, %69 : vector<2x8x6xf32>
    %71 = arith.addf %65, %70 : vector<2x8x6xf32>
    %72 = vector.extract_strided_slice %54 {offsets = [0, 0, 3], sizes = [2, 8, 1], strides = [1, 1, 1]} : vector<2x8x8xf32> to vector<2x8x1xf32>
    %73 = vector.extract_strided_slice %9 {offsets = [0, 3, 0], sizes = [2, 1, 6], strides = [1, 1, 1]} : vector<2x8x6xf32> to vector<2x1x6xf32>
    %74 = vector.broadcast %72 : vector<2x8x1xf32> to vector<2x8x6xf32>
    %75 = vector.broadcast %73 : vector<2x1x6xf32> to vector<2x8x6xf32>
    %76 = arith.mulf %74, %75 : vector<2x8x6xf32>
    %77 = arith.addf %71, %76 : vector<2x8x6xf32>
    %78 = vector.extract_strided_slice %54 {offsets = [0, 0, 4], sizes = [2, 8, 1], strides = [1, 1, 1]} : vector<2x8x8xf32> to vector<2x8x1xf32>
    %79 = vector.extract_strided_slice %9 {offsets = [0, 4, 0], sizes = [2, 1, 6], strides = [1, 1, 1]} : vector<2x8x6xf32> to vector<2x1x6xf32>
    %80 = vector.broadcast %78 : vector<2x8x1xf32> to vector<2x8x6xf32>
    %81 = vector.broadcast %79 : vector<2x1x6xf32> to vector<2x8x6xf32>
    %82 = arith.mulf %80, %81 : vector<2x8x6xf32>
    %83 = arith.addf %77, %82 : vector<2x8x6xf32>
    %84 = vector.extract_strided_slice %54 {offsets = [0, 0, 5], sizes = [2, 8, 1], strides = [1, 1, 1]} : vector<2x8x8xf32> to vector<2x8x1xf32>
    %85 = vector.extract_strided_slice %9 {offsets = [0, 5, 0], sizes = [2, 1, 6], strides = [1, 1, 1]} : vector<2x8x6xf32> to vector<2x1x6xf32>
    %86 = vector.broadcast %84 : vector<2x8x1xf32> to vector<2x8x6xf32>
    %87 = vector.broadcast %85 : vector<2x1x6xf32> to vector<2x8x6xf32>
    %88 = arith.mulf %86, %87 : vector<2x8x6xf32>
    %89 = arith.addf %83, %88 : vector<2x8x6xf32>
    %90 = vector.extract_strided_slice %54 {offsets = [0, 0, 6], sizes = [2, 8, 1], strides = [1, 1, 1]} : vector<2x8x8xf32> to vector<2x8x1xf32>
    %91 = vector.extract_strided_slice %9 {offsets = [0, 6, 0], sizes = [2, 1, 6], strides = [1, 1, 1]} : vector<2x8x6xf32> to vector<2x1x6xf32>
    %92 = vector.broadcast %90 : vector<2x8x1xf32> to vector<2x8x6xf32>
    %93 = vector.broadcast %91 : vector<2x1x6xf32> to vector<2x8x6xf32>
    %94 = arith.mulf %92, %93 : vector<2x8x6xf32>
    %95 = arith.addf %89, %94 : vector<2x8x6xf32>
    %96 = vector.extract_strided_slice %54 {offsets = [0, 0, 7], sizes = [2, 8, 1], strides = [1, 1, 1]} : vector<2x8x8xf32> to vector<2x8x1xf32>
    %97 = vector.extract_strided_slice %9 {offsets = [0, 7, 0], sizes = [2, 1, 6], strides = [1, 1, 1]} : vector<2x8x6xf32> to vector<2x1x6xf32>
    %98 = vector.broadcast %96 : vector<2x8x1xf32> to vector<2x8x6xf32>
    %99 = vector.broadcast %97 : vector<2x1x6xf32> to vector<2x8x6xf32>
    %100 = arith.mulf %98, %99 : vector<2x8x6xf32>
    %101 = arith.addf %95, %100 : vector<2x8x6xf32>
    %102 = vector.shape_cast %101 : vector<2x8x6xf32> to vector<16x6xf32>
    %103 = vector.extract_strided_slice %1 {offsets = [0, 18], sizes = [6, 32], strides = [1, 1]} : vector<16x128xf32> to vector<6x32xf32>
    %cst_5 = arith.constant dense<0.000000e+00> : vector<16x32xf32>
    %104 = tpu.matmul %102, %103, %cst_5 {dimension_numbers = #tpu.dot_dimension_numbers<[1], [0], [0], [1], [0, 0, 1, 1], [], []>} : vector<16x6xf32>, vector<6x32xf32>, vector<16x32xf32> -> vector<16x32xf32>
    %105 = vector.extract_strided_slice %1 {offsets = [8, 0], sizes = [1, 32], strides = [1, 1]} : vector<16x128xf32> to vector<1x32xf32>
    %106 = vector.broadcast %105 : vector<1x32xf32> to vector<16x32xf32>
    %107 = arith.addf %104, %106 : vector<16x32xf32>
    %108 = vector.extract_strided_slice %1 {offsets = [0, 50], sizes = [6, 32], strides = [1, 1]} : vector<16x128xf32> to vector<6x32xf32>
    %cst_6 = arith.constant dense<0.000000e+00> : vector<16x6xf32>
    %109 = tpu.matmul %107, %108, %cst_6 {dimension_numbers = #tpu.dot_dimension_numbers<[1], [1], [0], [0], [0, 0, 1, 0], [], []>} : vector<16x32xf32>, vector<6x32xf32>, vector<16x6xf32> -> vector<16x6xf32>
    %110 = vector.extract_strided_slice %1 {offsets = [9, 0], sizes = [1, 6], strides = [1, 1]} : vector<16x128xf32> to vector<1x6xf32>
    %111 = vector.broadcast %110 : vector<1x6xf32> to vector<16x6xf32>
    %112 = arith.addf %109, %111 : vector<16x6xf32>
    %cst_7 = arith.constant 0.000000e+00 : f32
    %113 = vector.broadcast %cst_7 : f32 to vector<16x6xf32>
    %114 = arith.maximumf %112, %113 : vector<16x6xf32>
    %115 = vector.shape_cast %114 : vector<16x6xf32> to vector<2x8x6xf32>
    %cst_8 = arith.constant dense<0.000000e+00> : vector<2x6xf32>
    %116 = vector.multi_reduction <add>, %115, %cst_8 [1] : vector<2x8x6xf32> to vector<2x6xf32>
    %cst_9 = arith.constant 8.000000e+00 : f32
    %117 = vector.broadcast %cst_9 : f32 to vector<2x6xf32>
    %118 = arith.divf %116, %117 : vector<2x6xf32>
    %119 = vector.extract_strided_slice %1 {offsets = [10, 0], sizes = [1, 6], strides = [1, 1]} : vector<16x128xf32> to vector<1x6xf32>
    %120 = vector.broadcast %119 : vector<1x6xf32> to vector<2x6xf32>
    %121 = arith.mulf %118, %120 : vector<2x6xf32>
    %cst_10 = arith.constant dense<0.000000e+00> : vector<2xf32>
    %122 = vector.multi_reduction <add>, %121, %cst_10 [1] : vector<2x6xf32> to vector<2xf32>
    %123 = vector.shape_cast %122 : vector<2xf32> to vector<2x1xf32>
    %124 = vector.extract_strided_slice %1 {offsets = [11, 0], sizes = [1, 1], strides = [1, 1]} : vector<16x128xf32> to vector<1x1xf32>
    %125 = vector.broadcast %124 : vector<1x1xf32> to vector<2x1xf32>
    %126 = arith.addf %123, %125 : vector<2x1xf32>
    %127 = vector.shape_cast %126 : vector<2x1xf32> to vector<1x2xf32>
    %c0_11 = arith.constant 0 : index
    %c0_12 = arith.constant 0 : index
    %128 = vector.load %arg2[%c0_11, %c0_12] : memref<1x2xf32, #tpu.memory_space<vmem>>, vector<1x2xf32>
    tpu.vector_store %arg2[%c0_11, %c0_12], %127 {strides = array<i32>} : memref<1x2xf32, #tpu.memory_space<vmem>>, vector<1x2xf32>,
    return
  }
}

</mosaic_0001>

<bundles_post_ra>
// kernel: tpu_custom_call.1
= control target key start
LH: loop header
LB: loop body
LE: loop exit
PB: predicated region body
PF: predicated region fallthrough
CT: control target
= control target key end

     0   :  { %vm23_vm0 = vcmask 1045504   ;;  %vm16_vm1 = vcmask 48128   ;;  %s1018_s0 = inlined_call_operand.vmem [shape: f32[16,6], index: 0, kind: input, shape index: {}]   ;;  %s1019_s1 = inlined_call_operand.vmem [shape: f32[16,128], index: 1, kind: input, shape index: {}]   ;;  %s1020_s2 = inlined_call_operand.hbm [shape: f32[1,2], index: 2, kind: output, shape index: {}]  }
   0x1   :  { %v864_v0 = vld [vmem:[%s1019_s1] sm:$0xff]  ;;  %v13_v2 = vld [vmem:[%s1018_s0 + $0x8] sm:$0xff] }
   0x2   :  { %v12_v1 = vld [vmem:[%s1018_s0] sm:$0xff]  ;;  %743 = vmatprep.subr.msk.mxu0 %vm23_vm0, %v864_v0 }
   0x3   :  { %745 = vmatprep.mubr.msk.f32.mxu0 %vm16_vm1, %v12_v1 }
   0x4   :  { %7 = vsyncpa [#allocation3], 0  ;;  %744 = vmatpush3.msk.msra.mxu0 %vm23_vm0, %v864_v0  ;;  %v833_v3 = vmov 1   ;;  %v834_v4 = vmov 0   ;;  %s835_s0 = smov 122   ;;  %v836_v7 = vmov 3   ;;  %v182_v22 = vlaneseq }
   0x5   :  { %773 = vset.pattern.permute.xlu1 %v833_v3  ;;  %746 = vmatmul.mubr.msk.f32.vlgmr.msra.gmra.mrb[0].mxu0 %vm16_vm1, %v13_v2  ;;  %v837_v8 = vmov 4   ;;  %v838_v9 = vmov 2   ;;  %v839_v10 = vmov 5   ;;  %vm292_vm2 = vcmask 64512   ;;  %s842_s15 = smov 110   ;;  %s843_s16 = smov 116  }
   0x6   :  { %772 = vset.pattern.permute.xlu0 %v834_v4  ;;  %v911_v24 = vshrl.u32 %v182_v22, 7  ;;  %s844_s17 = smov 78   ;;  %vm574_vm3 = vcmask 261120   ;;  %vm686_vm4 = vcmask 1041409   ;;  %vm689_vm5 = vcmask 41984  }
   0x7   :  { %vm709_vm6 = vcmask 8192  }
   0x8   :  { %v914_v26 = vsub.s32 0, %v911_v24  ;;  %v917_v27 = vsub.s32 1, %v911_v24  ;;  %v920_v28 = vsub.s32 2, %v911_v24  ;;  %v923_v31 = vsub.s32 3, %v911_v24 }
   0x9   :  { %v930_v36 = vsub.s32 4, %v911_v24  ;;  %v934_v42 = vsub.s32 5, %v911_v24 }
  0xd8   :  { %v880_v5 = vpop.f32.mrb[0].mxu0 }
  0xd9   :  { %197 = vperm.xlu1 %773, %v880_v5   ;;  %v883_v6 = vpop.f32.mrb[1].mxu0 }
  0xda   :  { %104 = vrot.lane.b32.xlu0 %v883_v6, %s835_s0 }
  0xdd   :  { %775 = vset.pattern.permute.xlu1 %v836_v7 }
  0xde   :  { %237 = vperm.xlu1 %775, %v880_v5   ;;  %106 = vrot.lane.b32.xlu0 %v880_v5, %s835_s0 }
  0xe2   :  { %776 = vset.pattern.permute.xlu1 %v837_v8  ;;  %179 = vperm.xlu0 %772, %v880_v5  }
  0xe3   :  { %257 = vperm.xlu1 %776, %v880_v5  }
  0xe6   :  { %774 = vset.pattern.permute.xlu0 %v838_v9 }
  0xe7   :  { %778 = vset.pattern.permute.xlu1 %v834_v4  ;;  %217 = vperm.xlu0 %774, %v880_v5  }
  0xe8   :  { %175 = vperm.xlu1 %778, %v883_v6  }
  0xeb   :  { %777 = vset.pattern.permute.xlu0 %v839_v10 }
  0xec   :  { %779 = vset.pattern.permute.xlu1 %v833_v3  ;;  %277 = vperm.xlu0 %777, %v880_v5  }
  0xed   :  { %193 = vperm.xlu1 %779, %v883_v6  }
  0xf0   :  { %782 = vset.pattern.permute.xlu0 %v837_v8 }
  0xf1   :  { %780 = vset.pattern.permute.xlu1 %v838_v9  ;;  %253 = vperm.xlu0 %782, %v883_v6  }
  0xf2   :  { %213 = vperm.xlu1 %780, %v883_v6  }
  0xf6   :  { %781 = vset.pattern.permute.xlu1 %v836_v7 }
  0xf7   :  { %233 = vperm.xlu1 %781, %v883_v6  }
  0xfb   :  { %783 = vset.pattern.permute.xlu1 %v839_v10 }
  0xfc   :  { %273 = vperm.xlu1 %783, %v883_v6  }
 0x14c   :  { %v105_v11 = vpop.permute.xlu0 %104 }
 0x14d   :  { %110 = vxpose.xlu1.b32.start.end [1/1] (short) (narrow) %v105_v11, 8 }
 0x150   :  { %v107_v12 = vpop.permute.xlu0 %106 }
 0x151   :  { %142 = vxpose.xlu0.b32.start.end [1/1] (short) (narrow) %v107_v12, 8 }
 0x158   :  { %v198_v13 = vpop.permute.xlu1 %197 }
 0x15d   :  { %v238_v14 = vpop.permute.xlu1 %237 }
 0x161   :  { %v180_v18 = vpop.permute.xlu0 %179 }
 0x162   :  { %v258_v15 = vpop.permute.xlu1 %257 }
 0x166   :  { %v218_v20 = vpop.permute.xlu0 %217 }
 0x167   :  { %v176_v16 = vpop.permute.xlu1 %175 }
 0x16b   :  { %784 = vset.pattern.permute.xlu1 %v834_v4  ;;  %v278_v23 = vpop.permute.xlu0 %277 }
 0x16c   :  { %v194_v17 = vpop.permute.xlu1 %193 }
 0x170   :  { %v254_v29 = vpop.permute.xlu0 %253 }
 0x171   :  { %v214_v19 = vpop.permute.xlu1 %213 }
 0x176   :  { %v234_v21 = vpop.permute.xlu1 %233 }
 0x17a   :  { %791 = vset.pattern.permute.xlu0 %v833_v3 }
 0x17b   :  { %v274_v25 = vpop.permute.xlu1 %273 }
 0x1cd   :  { %v126_v30 = vpop.trf.xlu1 }
 0x1ce   :  { %v185_v32 = vrot.slane %v126_v30, %v914_v26  ;;  %v203_v33 = vrot.slane %v126_v30, %v917_v27  ;;  %v223_v34 = vrot.slane %v126_v30, %v920_v28  ;;  %v243_v35 = vrot.slane %v126_v30, %v923_v31 }
 0x1cf   :  { %v263_v41 = vrot.slane %v126_v30, %v930_v36  ;;  %v283_v48 = vrot.slane %v126_v30, %v934_v42 }
 0x1d0   :  { %v190_v37 = vmul.f32 %v185_v32, %v176_v16  ;;  %v208_v38 = vmul.f32 %v203_v33, %v194_v17  ;;  %v228_v40 = vmul.f32 %v223_v34, %v214_v19  ;;  %v248_v47 = vmul.f32 %v243_v35, %v234_v21 }
 0x1d1   :  { %v158_v39 = vpop.trf.xlu0  ;;  %v268_v53 = vmul.f32 %v263_v41, %v254_v29  ;;  %v288_v58 = vmul.f32 %v283_v48, %v274_v25  ;;  %v346_v48 = vrot.slane %v883_v6, %v917_v27 }
 0x1d2   :  { %v189_v43 = vrot.slane %v158_v39, %v914_v26  ;;  %v207_v44 = vrot.slane %v158_v39, %v917_v27  ;;  %v227_v45 = vrot.slane %v158_v39, %v920_v28  ;;  %v210_v46 = vadd.f32 %v208_v38, %v190_v37 }
 0x1d3   :  { %v247_v52 = vrot.slane %v158_v39, %v923_v31  ;;  %v267_v57 = vrot.slane %v158_v39, %v930_v36  ;;  %v287_v62 = vrot.slane %v158_v39, %v934_v42  ;;  %v840_v39 = vmov 6  }
 0x1d4   :  { %v230_v49 = vadd.f32 %v228_v40, %v210_v46  ;;  %v191_v50 = vmul.f32 %v189_v43, %v180_v18  ;;  %v209_v51 = vmul.f32 %v207_v44, %v198_v13  ;;  %v229_v56 = vmul.f32 %v227_v45, %v218_v20 }
 0x1d5   :  { %v249_v61 = vmul.f32 %v247_v52, %v238_v14  ;;  %v269_v2 = vmul.f32 %v267_v57, %v258_v15  ;;  %v289_v13 = vmul.f32 %v287_v62, %v278_v23  ;;  %v406_v62 = vrot.slane %v883_v6, %v930_v36 }
 0x1d6   :  { %v250_v54 = vadd.f32 %v248_v47, %v230_v49  ;;  %v211_v55 = vadd.f32 %v209_v51, %v191_v50  ;;  %v328_v47 = vrot.slane %v883_v6, %v914_v26 }
 0x1d8   :  { %v270_v59 = vadd.f32 %v268_v53, %v250_v54  ;;  %v231_v60 = vadd.f32 %v229_v56, %v211_v55  ;;  %v386_v53 = vrot.slane %v883_v6, %v923_v31  ;;  %v350_v55 = vrot.slane %v880_v5, %v917_v27 }
 0x1da   :  { %v290_v63 = vadd.f32 %v288_v58, %v270_v59  ;;  %v251_v1 = vadd.f32 %v249_v61, %v231_v60  ;;  %v332_v58 = vrot.slane %v880_v5, %v914_v26  ;;  %v370_v60 = vrot.slane %v880_v5, %v920_v28 }
 0x1dc   :  { %v293_v11 = vsel %vm292_vm2, %v290_v63, -inf  ;;  %v271_v12 = vadd.f32 %v269_v2, %v251_v1  ;;  %v390_v1 = vrot.slane %v880_v5, %v923_v31 }
 0x1dd   :  { %294 = vmax.xlane.f32.xlu0 %v293_v11 }
 0x1de   :  { %v291_v16 = vadd.f32 %v289_v13, %v271_v12 }
 0x1e0   :  { %v296_v17 = vsel %vm292_vm2, %v291_v16, -inf }
 0x1e1   :  { %297 = vmax.xlane.f32.xlu1 %v296_v17 }
 0x26a   :  { %v295_v18 = vpop.xlane.xlu0 %294 }
 0x26b   :  { %v299_v19 = vsub.f32 %v290_v63, %v295_v18  ;;  %v445_v63 = vsub.s32 6, %v911_v24  ;;  %v426_v18 = vrot.slane %v883_v6, %v934_v42 }
 0x26d   :  { %v301_v20 = vmul.f32 1.442695, %v299_v19 }
 0x26e   :  { %v298_v21 = vpop.xlane.xlu1 %297 }
 0x26f   :  { %801 = vpow2.f32 %v301_v20  ;;  %v300_v14 = vsub.f32 %v291_v16, %v298_v21  ;;  %v410_v21 = vrot.slane %v880_v5, %v930_v36 }
 0x271   :  { %v303_v25 = vmul.f32 1.442695, %v300_v14 }
 0x273   :  { %803 = vpow2.f32 %v303_v25  ;;  %v430_v25 = vrot.slane %v880_v5, %v934_v42 }
 0x279   :  { %v802_v29 = vpop.eup %801 }
 0x27a   :  { %v305_v15 = vsel %vm292_vm2, %v802_v29, 0.0 }
 0x27b   :  { %306 = vadd.xlane.f32.xlu1 %v305_v15 }
 0x27d   :  { %v804_v30 = vpop.eup %803 }
 0x27e   :  { %v308_v23 = vsel %vm292_vm2, %v804_v30, 0.0 }
 0x27f   :  { %309 = vadd.xlane.f32.xlu0 %v308_v23 }
 0x308   :  { %v307_v32 = vpop.xlane.xlu1 %306 }
 0x309   :  { %805 = vrcp.f32 %v307_v32 }
 0x30c   :  { %v310_v33 = vpop.xlane.xlu0 %309 }
 0x30d   :  { %807 = vrcp.f32 %v310_v33  ;;  %v446_v33 = vrot.slane %v883_v6, %v445_v63 }
 0x313   :  { %v806_v34 = vpop.eup %805 }
 0x314   :  { %v312_v35 = vmul.f32 %v806_v34, %v802_v29  ;;  %v465_v29 = vsub.s32 7, %v911_v24 }
 0x316   :  { %336 = vperm.xlu0 %791, %v312_v35  }
 0x317   :  { %v808_v37 = vpop.eup %807 }
 0x318   :  { %v314_v38 = vmul.f32 %v808_v37, %v804_v30 }
 0x31a   :  { %795 = vset.pattern.permute.xlu0 %v839_v10  ;;  %322 = vperm.xlu1 %784, %v314_v38  }
 0x31b   :  { %416 = vperm.xlu0 %795, %v312_v35  }
 0x31e   :  { %785 = vset.pattern.permute.xlu1 %v833_v3  ;;  %v841_v3 = vmov 7  }
 0x31f   :  { %796 = vset.pattern.permute.xlu0 %v840_v39  ;;  %340 = vperm.xlu1 %785, %v314_v38  }
 0x320   :  { %440 = vperm.xlu0 %796, %v314_v38  }
 0x323   :  { %786 = vset.pattern.permute.xlu1 %v838_v9 }
 0x324   :  { %360 = vperm.xlu1 %786, %v314_v38   ;;  %800 = vset.pattern.permute.xlu0 %v834_v4 }
 0x325   :  { %485 = vrot.lane.b32.xlu0 %v864_v0, %s842_s15 }
 0x328   :  { %787 = vset.pattern.permute.xlu1 %v836_v7 }
 0x329   :  { %380 = vperm.xlu1 %787, %v314_v38  }
 0x32d   :  { %788 = vset.pattern.permute.xlu1 %v837_v8 }
 0x32e   :  { %400 = vperm.xlu1 %788, %v314_v38  }
 0x332   :  { %789 = vset.pattern.permute.xlu1 %v839_v10 }
 0x333   :  { %420 = vperm.xlu1 %789, %v314_v38  }
 0x337   :  { %790 = vset.pattern.permute.xlu1 %v834_v4 }
 0x338   :  { %317 = vperm.xlu1 %790, %v312_v35  }
 0x33c   :  { %792 = vset.pattern.permute.xlu1 %v838_v9 }
 0x33d   :  { %356 = vperm.xlu1 %792, %v312_v35  }
 0x341   :  { %793 = vset.pattern.permute.xlu1 %v836_v7 }
 0x342   :  { %376 = vperm.xlu1 %793, %v312_v35  }
 0x346   :  { %794 = vset.pattern.permute.xlu1 %v837_v8 }
 0x347   :  { %396 = vperm.xlu1 %794, %v312_v35  }
 0x34b   :  { %797 = vset.pattern.permute.xlu1 %v840_v39 }
 0x34c   :  { %436 = vperm.xlu1 %797, %v312_v35  }
 0x350   :  { %798 = vset.pattern.permute.xlu1 %v841_v3  ;;  %v466_v3 = vrot.slane %v883_v6, %v465_v29 }
 0x351   :  { %456 = vperm.xlu1 %798, %v312_v35  }
 0x355   :  { %460 = vperm.xlu1 %798, %v314_v38  }
 0x359   :  { %799 = vset.pattern.permute.xlu1 %v834_v4  ;;  %v366_v4 = vrot.slane %v883_v6, %v920_v28 }
 0x395   :  { %v337_v44 = vpop.permute.xlu0 %336 }
 0x396   :  { %v351_v50 = vmul.f32 %v346_v48, %v337_v44 }
 0x399   :  { %v323_v10 = vpop.permute.xlu1 %322 }
 0x39a   :  { %v417_v45 = vpop.permute.xlu0 %416  ;;  %v334_v12 = vmul.f32 %v332_v58, %v323_v10  ;;  %v450_v10 = vrot.slane %v880_v5, %v445_v63 }
 0x39b   :  { %v431_v15 = vmul.f32 %v426_v18, %v417_v45 }
 0x39e   :  { %v341_v9 = vpop.permute.xlu1 %340 }
 0x39f   :  { %v441_v54 = vpop.permute.xlu0 %440  ;;  %v352_v59 = vmul.f32 %v350_v55, %v341_v9 }
 0x3a1   :  { %v354_v19 = vadd.f32 %v352_v59, %v334_v12 }
 0x3a3   :  { %v361_v40 = vpop.permute.xlu1 %360  ;;  %v486_v11 = vpop.permute.xlu0 %485 }
 0x3a4   :  { %v372_v13 = vmul.f32 %v370_v60, %v361_v40  ;;  %748 = vmatprep.subr.msk.mxu1 %vm23_vm0, %v486_v11 }
 0x3a5   :  { %749 = vmatpush3.msk.msra.mxu1 %vm23_vm0, %v486_v11 }
 0x3a6   :  { %v374_v30 = vadd.f32 %v372_v13, %v354_v19 }
 0x3a8   :  { %v381_v41 = vpop.permute.xlu1 %380 }
 0x3a9   :  { %v392_v20 = vmul.f32 %v390_v1, %v381_v41  ;;  %v452_v41 = vmul.f32 %v450_v10, %v441_v54 }
 0x3ab   :  { %v394_v34 = vadd.f32 %v392_v20, %v374_v30 }
 0x3ad   :  { %v401_v7 = vpop.permute.xlu1 %400 }
 0x3ae   :  { %v412_v23 = vmul.f32 %v410_v21, %v401_v7  ;;  %v470_v7 = vrot.slane %v880_v5, %v465_v29  ;;  %v15_v5 = vld [vmem:[%s1019_s1 + $0x8] sm:$0xff]  ;;  %s845_s1 = smov [#allocation2]  }
 0x3af   :  { %v696_v30 = vrot.slane %v15_v5, %v923_v31  ;;  %s717_s20 = sshll.u32 %s845_s1, 4  ;;  %s718_s20 = int_to_ptr.vmem [resolvable:$true] %s717_s20 }
 0x3b0   :  { %v414_v39 = vadd.f32 %v412_v23, %v394_v34  ;;  %s809_s21 = scalar_lea.vmem %s718_s20, 16  ;;  %s813_s22 = scalar_lea.vmem %s718_s20, 32 }
 0x3b1   :  { %p810_p0 = scmp.ne.s32.totalorder %s718_s20, %s809_s21  ;;  %p814_p1 = scmp.lt.s32.totalorder %s718_s20, %s718_s20 }
 0x3b2   :  { %v421_v43 = vpop.permute.xlu1 %420  ;;  %p815_p2 = scmp.lt.s32.totalorder %s813_s22, %s809_s21 }
 0x3b3   :  { %v432_v35 = vmul.f32 %v430_v25, %v421_v43 }
 0x3b4   :  { %p816_p3 = por %p815_p2, %p814_p1 }
 0x3b5   :  { %v434_v9 = vadd.f32 %v432_v35, %v414_v39 }
 0x3b6   :  { %p817_p4 = pnand %p816_p3, %p810_p0 }
 0x3b7   :  { %v318_v8 = vpop.permute.xlu1 %317  ;;  %v454_v45 = vadd.f32 %v452_v41, %v434_v9 }
 0x3b8   :  { %v333_v49 = vmul.f32 %v328_v47, %v318_v8 }
 0x3ba   :  { %v353_v56 = vadd.f32 %v351_v50, %v333_v49  ;;  %v478_v49 = vrot.slane %v15_v5, %v914_v26 }
 0x3bc   :  { %v357_v46 = vpop.permute.xlu1 %356 }
 0x3bd   :  { %v371_v51 = vmul.f32 %v366_v4, %v357_v46 }
 0x3bf   :  { %v373_v61 = vadd.f32 %v371_v51, %v353_v56 }
 0x3c1   :  { %v377_v52 = vpop.permute.xlu1 %376 }
 0x3c2   :  { %v391_v57 = vmul.f32 %v386_v53, %v377_v52  ;;  %v571_v52 = vrot.slane %v15_v5, %v917_v27 }
 0x3c4   :  { %v393_v16 = vadd.f32 %v391_v57, %v373_v61 }
 0x3c6   :  { %v397_v2 = vpop.permute.xlu1 %396 }
 0x3c7   :  { %v411_v17 = vmul.f32 %v406_v62, %v397_v2 }
 0x3c9   :  { %v413_v14 = vadd.f32 %v411_v17, %v393_v16  ;;  %v680_v17 = vrot.slane %v15_v5, %v920_v28 }
 0x3cb   :  { %v437_v32 = vpop.permute.xlu1 %436  ;;  %v433_v37 = vadd.f32 %v431_v15, %v413_v14 }
 0x3cc   :  { %v451_v38 = vmul.f32 %v446_v33, %v437_v32  ;;  %v703_v33 = vand.u32 127, %v182_v22 }
 0x3ce   :  { %v453_v42 = vadd.f32 %v451_v38, %v433_v37  ;;  %v706_v28 = vsub.s32 %v703_v33, %v911_v24 }
 0x3d0   :  { %v457_v36 = vpop.permute.xlu1 %456 }
 0x3d1   :  { %v471_v40 = vmul.f32 %v466_v3, %v457_v36 }
 0x3d3   :  { %v473_v44 = vadd.f32 %v471_v40, %v453_v42 }
 0x3d4   :  { %v461_v8 = vpop.permute.xlu1 %460 }
 0x3d5   :  { %v472_v46 = vmul.f32 %v470_v7, %v461_v8  ;;  %481 = vrot.lane.b32.xlu1 %v473_v44, %s843_s16 }
 0x3d7   :  { %v474_v43 = vadd.f32 %v472_v46, %v454_v45 }
 0x3d9   :  { %483 = vrot.lane.b32.xlu0 %v474_v43, %s843_s16  ;;  %572 = vrot.lane.b32.xlu1 %v864_v0, %s844_s17 }
 0x447   :  { %v482_v6 = vpop.permute.xlu1 %481 }
 0x448   :  { %750 = vmatprep.mubr.msk.f32.mxu1 %vm16_vm1, %v482_v6 }
 0x44b   :  { %v484_v47 = vpop.permute.xlu0 %483  ;;  %v573_v48 = vpop.permute.xlu1 %572 }
 0x44c   :  { %751 = vmatmul.mubr.msk.f32.vlgmr.msra.gmra.mrb[0].mxu1 %vm16_vm1, %v484_v47  ;;  %753 = vmatprep.subr.msk.mxu0 %vm574_vm3, %v573_v48 }
 0x44d   :  { %754 = vmatpush3.xpose.msk.msra.mxu0 %vm574_vm3, %v573_v48 }
 0x51f   :  { %v752_v4 = vpop.f32.mrb[0].mxu1 }
 0x520   :  { %v559_v50 = vpop.f32.mrb[1].mxu1  ;;  %v565_v0 = vadd.f32 %v752_v4, %v478_v49 }
 0x521   :  { %v560_v51 = vadd.f32 %v559_v50, %v478_v49 }
 0x523   :  { %755 = vmatprep.mubr.msk.f32.mxu0 %vm574_vm3, %v560_v51 }
 0x524   :  { %756 = vmatmul.mubr.msk.f32.vlgmr.msra.gmra.mrb[2].mxu0 %vm574_vm3, %v565_v0 }
 0x5f7   :  { %v757_v53 = vpop.f32.mrb[2].mxu0 }
 0x5f8   :  { %v655_v54 = vadd.f32 %v757_v53, %v571_v52  ;;  %v649_v55 = vpop.f32.mrb[3].mxu0 }
 0x5f9   :  { %v650_v56 = vadd.f32 %v649_v55, %v571_v52 }
 0x5fa   :  { %v659_v57 = vmax.f32 %v655_v54, 0.0 }
 0x5fb   :  { %v658_v58 = vmax.f32 %v650_v56, 0.0 }
 0x5fc   :  { %v667_v59 = vsel %vm16_vm1, %v659_v57, 0.0 }
 0x5fd   :  { %v668_v60 = vrot.slane %v667_v59, 4  ;;  %v660_v61 = vsel %vm16_vm1, %v658_v58, 0.0 }
 0x5fe   :  { %v661_v26 = vrot.slane %v660_v61, 4 }
 0x5ff   :  { %v669_v62 = vadd.f32 %v668_v60, %v667_v59 }
 0x600   :  { %v662_v63 = vadd.f32 %v661_v26, %v660_v61 }
 0x601   :  { %v670_v1 = vrot.slane %v669_v62, 2 }
 0x602   :  { %v663_v2 = vrot.slane %v662_v63, 2 }
 0x603   :  { %v671_v11 = vadd.f32 %v670_v1, %v669_v62 }
 0x604   :  { %v664_v12 = vadd.f32 %v663_v2, %v662_v63 }
 0x605   :  { %v672_v13 = vrot.slane %v671_v11, 1 }
 0x606   :  { %v665_v27 = vrot.slane %v664_v12, 1 }
 0x607   :  { %v673_v16 = vadd.f32 %v672_v13, %v671_v11 }
 0x608   :  { %v666_v18 = vadd.f32 %v665_v27, %v664_v12 }
 0x609   :  { %v676_v19 = vmul.f32 0.125, %v673_v16 }
 0x60a   :  { %v675_v20 = vmul.f32 0.125, %v666_v18 }
 0x60b   :  { %v682_v21 = vmul.f32 %v680_v17, %v676_v19 }
 0x60c   :  { %v681_v14 = vmul.f32 %v680_v17, %v675_v20 }
 0x60d   :  { %v685_v25 = vrot.slane %v682_v21, 7 }
 0x60f   :  { %v687_v29 = vsel %vm686_vm4, %v685_v25, %v681_v14 }
 0x610   :  { %v690_v15 = vsel %vm689_vm5, %v687_v29, 0.0 }
 0x611   :  { %691 = vadd.xlane.f32.xlu0 %v690_v15 }
 0x69e   :  { %v692_v23 = vpop.xlane.xlu0 %691 }
 0x69f   :  { %v697_v32 = vadd.f32 %v696_v30, %v692_v23 }
 0x6a1   :  { %700 = vperm.xlu1 %799, %v697_v32  }
 0x720   :  { %v701_v34 = vpop.permute.xlu1 %700 }
 0x721   :  { %v707_v35 = vrot.slane %v701_v34, %v706_v28 }
 0x723   :  { %710 = vst.msk [vmem:[#allocation2] sm:$0x1] %vm709_vm6, %v707_v35 }
 0x724   :  { %820 = shalt.err (!%p817_p4)
}
 0x725   :  { %s821_s25 = scalar_lea.hbm %s1020_s2, 16 }
 0x726   :  { %p822_p5 = scmp.ne.s32.totalorder %s1020_s2, %s821_s25  ;;  %p825_p6 = scmp.lt.u32.totalorder %s821_s25, %s1020_s2 }
 0x728   :  { %p827_p7 = pnand %p825_p6, %p822_p5 }
 0x72a   :  { %830 = shalt.err (!%p827_p7)
}
 0x72b   :  { %720 = dma.vmem_to_hbm [thread:$0]  %s718_s20, 16, %s1020_s2, [#allocation3]  }
 0x72c   :  { %831 = dma.done.wait [#allocation3], 16  }
 0x72d   :  { %832 = vsyncadd [#allocation3], 4294967280 }
 0x72e   :  { %724 = vsyncpa [#allocation3], 1 }

</bundles_post_ra>
